<compile_context>
chip_gen: v7x
topology: tpu7x:2x2x1
jax: 0.10.0
libtpu: 0.0.40
codegen_flags: <defaults>
</compile_context>

<pallas_src>
import jax
import jax.numpy as jnp
import numpy as np
from jax.experimental import pallas as pl
from jax.experimental.pallas import tpu as pltpu


_TARGET_TILE_BYTES = 2 * 1024 * 1024  # ~2 MiB per x tile -> ~12 MiB VMEM double-buffered


def _make_pe(width: int, max_seq_length: int) -> jnp.ndarray:
    """Sinusoidal PE table, exactly mirroring the PyTorch __init__ double loop."""
    pos = np.arange(max_seq_length, dtype=np.float64)[:, None]      # (S, 1)
    i = np.arange(width, dtype=np.float64)[None, :]                 # (1, W)
    even_i = i - (i % 2)                                            # i (even) / i-1 (odd)
    angle = pos / np.power(10000.0, even_i / width)                 # (S, W)
    pe = np.where((np.arange(width) % 2) == 0, np.sin(angle), np.cos(angle))
    return jnp.asarray(pe, dtype=jnp.float32)[None, :, :]           # (1, S, W)


def _add_pe_kernel(x_ref, pe_ref, o_ref):
    # pe block is either the same shape as the x block (Path A) or a single
    # row that broadcasts over the x block's rows (Path B).
    o_ref[...] = x_ref[...] + pe_ref[...]


def _pick_tile(dim: int, unit: int, max_elems: int) -> int:
    """Pick a legal block size for one dim: divides `dim`, and is either a
    multiple of `unit` (TPU (8,128) rule) or equal to the full dim. Prefers the
    largest choice <= max_elems; falls back to the full extent."""
    if dim <= max_elems:
        return dim                                  # full extent: always legal
    best = None
    d = unit
    while d <= max_elems:
        if dim % d == 0:
            best = d
        d += unit
    return best if best is not None else dim        # fall back to full extent


def positional_embedding_forward(x: jnp.ndarray, pe: jnp.ndarray) -> jnp.ndarray:
    """x: (B, S, W); pe: (1, S, W) -> x + pe (pe broadcast over the batch)."""
    B, S, W = x.shape
    assert pe.shape == (1, S, W)
    pe = pe.astype(x.dtype)
    itemsize = jnp.dtype(x.dtype).itemsize

    if W % 128 == 0 and S % 8 == 0:
        # ---- Path A: lane axis = W (already a multiple of 128). ----
        # x viewed as (B*S, W); pe rows repeat with period S along the rows.
        x2 = x.reshape(B * S, W)
        pe_arg = pe.reshape(S, W)

        tc = _pick_tile(W, 128, max(128, _TARGET_TILE_BYTES // (8 * itemsize)))
        tr = _pick_tile(S, 8, max(8, _TARGET_TILE_BYTES // (tc * itemsize)))
        n_r, n_c = (B * S) // tr, W // tc
        n_pe_r = S // tr                                   # pe row-tile period

        grid = (n_r, n_c)
        in_specs = [
            pl.BlockSpec((tr, tc), lambda i, j: (i, j)),              # x tile
            pl.BlockSpec((tr, tc), lambda i, j: (i % n_pe_r, j)),     # pe tile (period S)
        ]
        out_spec = pl.BlockSpec((tr, tc), lambda i, j: (i, j))
        out2_shape = (B * S, W)
    else:
        # ---- Path B: lane axis = flattened S*W (lane-dense even when W < 128). ----
        x2 = x.reshape(B, S * W)
        pe_arg = pe.reshape(1, S * W)

        tc = _pick_tile(S * W, 128, max(128, _TARGET_TILE_BYTES // (8 * itemsize)))
        tb = _pick_tile(B, 8, max(8, _TARGET_TILE_BYTES // (tc * itemsize)))
        n_r, n_c = B // tb, (S * W) // tc

        grid = (n_r, n_c)
        in_specs = [
            pl.BlockSpec((tb, tc), lambda i, j: (i, j)),   # x tile
            pl.BlockSpec((1, tc), lambda i, j: (0, j)),    # pe row: constant along the
                                                           # batch axis -> stays resident;
                                                           # broadcast in-kernel over rows
        ]
        out_spec = pl.BlockSpec((tb, tc), lambda i, j: (i, j))
        out2_shape = (B, S * W)

    out2 = pl.pallas_call(
        _add_pe_kernel,
        out_shape=jax.ShapeDtypeStruct(out2_shape, x.dtype),
        grid_spec=pltpu.PrefetchScalarGridSpec(
            num_scalar_prefetch=0,
            grid=grid,
            in_specs=in_specs,
            out_specs=out_spec,
        ),
        compiler_params=pltpu.CompilerParams(
            dimension_semantics=("parallel", "parallel"),
        ),
    )(x2, pe_arg)

    return out2.reshape(B, S, W)


if __name__ == "__main__":
    # Primary small shape consistent with the module: batch=2, seq=8, width=32.
    batch, max_seq_length, width = 2, 8, 32
    key = jax.random.PRNGKey(0)
    x = jax.random.normal(key, (batch, max_seq_length, width), dtype=jnp.float32)
    pe = _make_pe(width, max_seq_length)

    out = jax.block_until_ready(positional_embedding_forward(x, pe))
    ref = x + pe
    assert jnp.allclose(out, ref, atol=1e-6), "mismatch vs reference (path B)"

    # Also exercise the lane-dense (B*S, W) path (W multiple of 128, S multiple of 8).
    b2, s2, w2 = 2, 64, 128
    x_a = jax.random.normal(jax.random.PRNGKey(0), (b2, s2, w2), dtype=jnp.float32)
    pe_a = _make_pe(w2, s2)
    out_a = jax.block_until_ready(positional_embedding_forward(x_a, pe_a))
    ref_a = x_a + pe_a
    assert jnp.allclose(out_a, ref_a, atol=1e-6), "mismatch vs reference (path A)"

    print("KERNEL_OK")
</pallas_src>

<mosaic_0001>
module attributes {stable_mosaic.version = 11 : i64} {
  func.func @_add_pe_kernel(%arg0: i32, %arg1: i32, %arg2: memref<2x256xf32, #tpu.memory_space<vmem>>, %arg3: memref<1x256xf32, #tpu.memory_space<vmem>>, %arg4: memref<2x256xf32, #tpu.memory_space<vmem>>) attributes {dimension_semantics = [#tpu.dimension_semantics<parallel>, #tpu.dimension_semantics<parallel>], iteration_bounds = array<i64: 1, 1>, scalar_prefetch = 0 : i64, scratch_operands = 0 : i64, tpu.core_type = #tpu.core_type<tc>, window_params = [{transform_indices = @transform_0, window_bounds = array<i64: 2, 256>}, {transform_indices = @transform_1, window_bounds = array<i64: 1, 256>}, {transform_indices = @transform_2, window_bounds = array<i64: 2, 256>}]} {
    %c0 = arith.constant 0 : index
    %c0_0 = arith.constant 0 : index
    %0 = vector.load %arg2[%c0, %c0_0] : memref<2x256xf32, #tpu.memory_space<vmem>>, vector<2x256xf32>
    %c0_1 = arith.constant 0 : index
    %c0_2 = arith.constant 0 : index
    %1 = vector.load %arg3[%c0_1, %c0_2] : memref<1x256xf32, #tpu.memory_space<vmem>>, vector<1x256xf32>
    %2 = vector.broadcast %1 : vector<1x256xf32> to vector<2x256xf32>
    %3 = arith.addf %0, %2 : vector<2x256xf32>
    %c0_3 = arith.constant 0 : index
    %c0_4 = arith.constant 0 : index
    %4 = vector.load %arg4[%c0_3, %c0_4] : memref<2x256xf32, #tpu.memory_space<vmem>>, vector<2x256xf32>
    tpu.vector_store %arg4[%c0_3, %c0_4], %3 {strides = array<i32>} : memref<2x256xf32, #tpu.memory_space<vmem>>, vector<2x256xf32>,
    return
  }
  func.func @transform_0(%arg0: i32, %arg1: i32) -> (i32, i32) {
    %c0_i32 = arith.constant 0 : i32
    return %arg0, %arg1 : i32, i32
  }
  func.func @transform_1(%arg0: i32, %arg1: i32) -> (i32, i32) {
    %c0_i32 = arith.constant 0 : i32
    %c0_i32_0 = arith.constant 0 : i32
    return %c0_i32, %arg1 : i32, i32
  }
  func.func @transform_2(%arg0: i32, %arg1: i32) -> (i32, i32) {
    %c0_i32 = arith.constant 0 : i32
    return %arg0, %arg1 : i32, i32
  }
}

</mosaic_0001>

<bundles_post_ra>
// kernel: tpu_custom_call.1
= control target key start
LH: loop header
LB: loop body
LE: loop exit
PB: predicated region body
PF: predicated region fallthrough
CT: control target
= control target key end

     0   :  { %7 = vsyncpa [#allocation3], 0  ;;  %s157_s0 = inlined_call_operand.hbm [shape: f32[2,256], index: 0, kind: input, shape index: {}]   ;;  %s158_s1 = inlined_call_operand.vmem [shape: f32[1,256], index: 1, kind: input, shape index: {}]   ;;  %s159_s2 = inlined_call_operand.hbm [shape: f32[2,256], index: 2, kind: output, shape index: {}]  }
   0x1   :  { %8 = vsyncpa [#allocation4], 0  ;;  %s112_s9 = smov [#allocation2]   ;;  %s64_s13 = scalar_lea.hbm %s157_s0, 64 }
   0x2   :  { %s15_s10 = sshll.u32 %s112_s9, 4  ;;  %p65_p0 = scmp.ne.s32.totalorder %s157_s0, %s64_s13  ;;  %s16_s10 = int_to_ptr.vmem [resolvable:$true] %s15_s10 }
   0x3   :  { %p68_p1 = scmp.lt.u32.totalorder %s64_s13, %s157_s0 }
   0x5   :  { %p70_p2 = pnand %p68_p1, %p65_p0 }
   0x7   :  { %73 = shalt.err (!%p70_p2)
}
   0x8   :  { %s74_s18 = scalar_lea.vmem %s16_s10, 64  ;;  %p79_p4 = scmp.lt.s32.totalorder %s16_s10, %s16_s10 }
   0x9   :  { %p75_p3 = scmp.ne.s32.totalorder %s16_s10, %s74_s18  ;;  %p80_p5 = scmp.lt.s32.totalorder %s74_s18, %s74_s18 }
   0xb   :  { %p81_p6 = por %p80_p5, %p79_p4 }
   0xd   :  { %p82_p7 = pnand %p81_p6, %p75_p3 }
   0xf   :  { %85 = shalt.err (!%p82_p7)
}
  0x10   :  { %18 = dma.hbm_to_vmem [thread:$0]  %s157_s0, 64, %s16_s10, [#allocation3]  }
  0x11   :  { %108 = dma.done.wait [#allocation3], 64  }
  0x12   :  { %109 = vsyncadd [#allocation3], 4294967232  ;;  %v27_v0 = vlaneseq  ;;  %v113_v1 = vmov 1983009808   ;;  %v25_v7 = vld [vmem:[%s158_s1] sm:$0x3] }
  0x13   :  { %v37_v2 = vunpack.c.l.s4 %v113_v1  ;;  %v24_v12 = vld [vmem:[#allocation2] sm:$0xf]  ;;  %s114_s23 = smov [#allocation5]  }
  0x14   :  { %v28_v3 = vshrl.u32 %v27_v0, 7  ;;  %s52_s0 = sshll.u32 %s114_s23, 4  ;;  %s53_s0 = int_to_ptr.vmem [resolvable:$true] %s52_s0 }
  0x15   :  { %v38_v6 = vunpack.c.0.s8 %v37_v2  ;;  %s86_s24 = scalar_lea.vmem %s53_s0, 64  ;;  %p91_p9 = scmp.lt.s32.totalorder %s53_s0, %s53_s0 }
  0x16   :  { %v29_v4 = vsub.s32 0, %v28_v3  ;;  %v33_v5 = vsub.s32 1, %v28_v3  ;;  %p87_p8 = scmp.ne.s32.totalorder %s53_s0, %s86_s24  ;;  %p92_p10 = scmp.lt.s32.totalorder %s86_s24, %s86_s24 }
  0x17   :  { %v41_v10 = vsub.s32 %v38_v6, %v28_v3 }
  0x18   :  { %v30_v8 = vrot.slane %v25_v7, %v29_v4  ;;  %v34_v9 = vrot.slane %v25_v7, %v33_v5  ;;  %p93_p11 = por %p92_p10, %p91_p9 }
  0x1a   :  { %v35_v11 = vcombine.low %v30_v8, %v34_v9  ;;  %p94_p12 = pnand %p93_p11, %p87_p8 }
  0x1c   :  { %v42_v13 = vrot.slane %v35_v11, %v41_v10 }
  0x1e   :  { %v44_v14 = vadd.f32 %v42_v13, %v24_v12 }
  0x20   :  { %45 = vst [vmem:[#allocation5] sm:$0xf] %v44_v14 }
  0x21   :  { %97 = shalt.err (!%p94_p12)
}
  0x22   :  { %s98_s26 = scalar_lea.hbm %s159_s2, 64 }
  0x23   :  { %p99_p13 = scmp.ne.s32.totalorder %s159_s2, %s98_s26  ;;  %p102_p0 = scmp.lt.u32.totalorder %s98_s26, %s159_s2 }
  0x25   :  { %p104_p1 = pnand %p102_p0, %p99_p13 }
  0x27   :  { %107 = shalt.err (!%p104_p1)
}
  0x28   :  { %55 = dma.vmem_to_hbm [thread:$0]  %s53_s0, 64, %s159_s2, [#allocation4]  }
  0x29   :  { %110 = dma.done.wait [#allocation4], 64  }
  0x2a   :  { %111 = vsyncadd [#allocation4], 4294967232 }
  0x2b   :  { %59 = vsyncpa [#allocation3], 1 }
  0x2c   :  { %60 = vsyncpa [#allocation4], 1 }

</bundles_post_ra>
